<compile_context>
chip_gen: v6e
topology: v6e:2x2x1
jax: 0.10.0
libtpu: 0.0.40
codegen_flags: <defaults>
</compile_context>

<pallas_src>
import functools

import jax
import jax.numpy as jnp
from jax.experimental import pallas as pl
from jax.experimental.pallas import tpu as pltpu


# ----------------------------------------------------------------------------
# helpers
# ----------------------------------------------------------------------------
def _round_up(n, m):
    return ((n + m - 1) // m) * m


def _vmem_tile_budget_bytes():
    """Generation-aware budget for the spatial tiles of the fused kernels."""
    try:
        cap = pltpu.get_tpu_info().vmem_capacity_bytes
    except Exception:
        cap = 64 << 20                       # assume the smallest (v7x) if unknown
    # v5e/v6e have 128 MiB VMEM -> allow bigger tiles; v7x (64 MiB) stays at 8 MiB.
    return (20 << 20) if cap >= (96 << 20) else (8 << 20)


def _choose_tile_hw(hw, c):
    """Largest multiple-of-128 divisor of hw whose kernel-A working set
    (spec + x + pre tiles, double buffered, f32) stays within the budget."""
    if hw % 128 != 0:
        return hw                                    # small / odd case: one tile
    budget = _vmem_tile_budget_bytes() - 8 * c * c   # account for resident Wc
    cap = max(128, ((budget // (24 * max(c, 1))) // 128) * 128)
    t = min(cap, hw)
    while hw % t != 0:
        t -= 128
    return t


# ----------------------------------------------------------------------------
# Kernel 1: spectral mixing  ( einsum 'bixy,ioxy->boxy' over complex numbers )
#           both retained-mode corners fused on the lane axis (M = 2*n1*n2),
#           whole-batch blocks, resident weights, 4-mult complex MAC.
# ----------------------------------------------------------------------------
def _spectral_mix_kernel(ar_ref, ai_ref, wr_ref, wi_ref, or_ref, oi_ref):
    # a: (Bt, Cin, M)   w: (Cin, Coutp, M)   out: (Bt, Coutp, M)
    bt, cin, m = ar_ref.shape
    cout = wr_ref.shape[1]
    a_r = ar_ref[...]
    a_i = ai_ref[...]
    acc_r = jnp.zeros((bt, cout, m), jnp.float32)
    acc_i = jnp.zeros((bt, cout, m), jnp.float32)
    # Short static trip count (== width).
    # TODO(synk): for width >~ 32 switch to lax.fori_loop(..., unroll=True) (vreg
    # pressure) or an MXU dot_general over the input-channel axis.
    for i in range(cin):
        ar = a_r[:, i:i + 1, :]              # (Bt, 1, M) -> broadcast over Cout
        ai = a_i[:, i:i + 1, :]
        wr = wr_ref[i][None]                 # (1, Cout, M) -> broadcast over batch
        wi = wi_ref[i][None]
        acc_r = acc_r + (ar * wr - ai * wi)  # plain 4-mult complex MAC
        acc_i = acc_i + (ar * wi + ai * wr)
    or_ref[...] = acc_r
    oi_ref[...] = acc_i


def _choose_batch_tile(B, cp, mp, budget=4 << 20):
    per_b = 32 * cp * mp                     # in/out blocks, double buffered, f32
    bt = max(1, min(B, budget // max(per_b, 1)))
    while B % bt != 0:
        bt -= 1
    return bt


def spectral_mix(a_re, a_im, w_re, w_im):
    B, C, Mp = a_re.shape
    Cp = w_re.shape[1]
    Bt = _choose_batch_tile(B, Cp, Mp)
    a_spec = pl.BlockSpec((Bt, C, Mp), lambda b: (b, 0, 0))
    w_spec = pl.BlockSpec((C, Cp, Mp), lambda b: (0, 0, 0))    # resident weights
    o_spec = pl.BlockSpec((Bt, Cp, Mp), lambda b: (b, 0, 0))
    return pl.pallas_call(
        _spectral_mix_kernel,
        out_shape=(jax.ShapeDtypeStruct((B, Cp, Mp), jnp.float32),
                   jax.ShapeDtypeStruct((B, Cp, Mp), jnp.float32)),
        grid_spec=pltpu.PrefetchScalarGridSpec(
            num_scalar_prefetch=0,
            grid=(B // Bt,),
            in_specs=[a_spec, a_spec, w_spec, w_spec],
            out_specs=(o_spec, o_spec),
        ),
        compiler_params=pltpu.CompilerParams(
            dimension_semantics=("parallel",),     # batch blocks are independent
            vmem_limit_bytes=32 << 20,
        ),
    )(a_re, a_im, w_re, w_im)


# ----------------------------------------------------------------------------
# Kernel 2 (A): pre = spec + Wc @ x  on (B, C, HW) views + per-channel BN stats
#               stats accumulate into grid-resident (C, 1) outputs.
# ----------------------------------------------------------------------------
def _pre_stats_kernel(spec_ref, x_ref, wc_ref, pre_ref, sum_ref, sq_ref):
    @pl.when((pl.program_id(0) == 0) & (pl.program_id(1) == 0))
    def _init():
        sum_ref[...] = jnp.zeros_like(sum_ref)
        sq_ref[...] = jnp.zeros_like(sq_ref)

    pre = spec_ref[0] + jnp.dot(wc_ref[...], x_ref[0],
                                preferred_element_type=jnp.float32)
    pre_ref[0] = pre
    sum_ref[...] += jnp.sum(pre, axis=1, keepdims=True)
    sq_ref[...] += jnp.sum(pre * pre, axis=1, keepdims=True)


def pre_and_stats(spec, x, wc, *, tile_hw):
    B, C, HW = spec.shape
    n_tiles = HW // tile_hw
    tile_spec = pl.BlockSpec((1, C, tile_hw), lambda b, t: (b, 0, t))
    stat_spec = pl.BlockSpec((C, 1), lambda b, t: (0, 0))      # resident accumulator
    return pl.pallas_call(
        _pre_stats_kernel,
        out_shape=(jax.ShapeDtypeStruct((B, C, HW), jnp.float32),
                   jax.ShapeDtypeStruct((C, 1), jnp.float32),
                   jax.ShapeDtypeStruct((C, 1), jnp.float32)),
        grid_spec=pltpu.PrefetchScalarGridSpec(
            num_scalar_prefetch=0,
            grid=(B, n_tiles),
            in_specs=[tile_spec, tile_spec,
                      pl.BlockSpec((C, C), lambda b, t: (0, 0))],   # Wc resident
            out_specs=(tile_spec, stat_spec, stat_spec),
        ),
        compiler_params=pltpu.CompilerParams(
            # Global BN reduction -> both axes sequential on one core.
            # TODO(synk): for width >= 16, shard channels across the two v7x
            # TensorCores (per-channel BN stats are independent).
            dimension_semantics=("arbitrary", "arbitrary"),
            vmem_limit_bytes=32 << 20,
        ),
    )(spec, x, wc)


# ----------------------------------------------------------------------------
# Kernel 3 (B): y = relu(pre * scale + shift)  applied in place (aliased).
# ----------------------------------------------------------------------------
def _bn_act_kernel(pre_ref, scale_ref, shift_ref, o_ref, *, activation):
    y = pre_ref[0] * scale_ref[...] + shift_ref[...]
    if activation:
        y = jnp.maximum(y, 0.0)
    o_ref[0] = y


def bn_act(pre, scale, shift, *, activation, tile_hw):
    B, C, HW = pre.shape
    n_tiles = HW // tile_hw
    tile_spec = pl.BlockSpec((1, C, tile_hw), lambda b, t: (b, 0, t))
    vec_spec = pl.BlockSpec((C, 1), lambda b, t: (0, 0))
    return pl.pallas_call(
        functools.partial(_bn_act_kernel, activation=activation),
        out_shape=jax.ShapeDtypeStruct((B, C, HW), jnp.float32),
        grid_spec=pltpu.PrefetchScalarGridSpec(
            num_scalar_prefetch=0,
            grid=(B, n_tiles),
            in_specs=[tile_spec, vec_spec, vec_spec],
            out_specs=tile_spec,
        ),
        input_output_aliases={0: 0},          # BN+ReLU in place on `pre`
        compiler_params=pltpu.CompilerParams(
            dimension_semantics=("parallel", "parallel"),
            vmem_limit_bytes=32 << 20,
        ),
    )(pre, scale, shift)


# ----------------------------------------------------------------------------
# Full forward pass (glue in plain JAX: FFTs, mode gather/scatter, BN fold)
# ----------------------------------------------------------------------------
def neural_fourier_block2d(x, params, *, n_modes, activation=True, eps=1e-5):
    B, C, H, W = x.shape
    n1, n2 = n_modes
    Wf = W // 2 + 1
    assert 2 * n1 <= H and n2 <= Wf, "n_modes too large for the spatial grid"
    M = n1 * n2
    M2 = 2 * M

    # TODO(synk): rfftn/irfftn have no Pallas TPU primitive; they stay in plain
    # JAX, as does the (tiny) Fourier-mode gather/scatter.
    x_ft = jnp.fft.rfftn(x, axes=(-2, -1))                       # (B, C, H, Wf) c64

    # Both retained-mode corners fused on the lane axis -> M2 = 2*n1*n2 modes.
    c1 = x_ft[:, :, :n1, :n2].reshape(B, C, M)
    c2 = x_ft[:, :, H - n1:, :n2].reshape(B, C, M)
    a = jnp.concatenate([c1, c2], axis=-1)                       # (B, C, M2)
    a_re = jnp.real(a).astype(jnp.float32)
    a_im = jnp.imag(a).astype(jnp.float32)

    w_re = jnp.concatenate([params["w1_re"].reshape(C, C, M),
                            params["w2_re"].reshape(C, C, M)], axis=-1)
    w_im = jnp.concatenate([params["w1_im"].reshape(C, C, M),
                            params["w2_im"].reshape(C, C, M)], axis=-1)

    # Lane-pad modes to a multiple of 128; sublane-pad the OUTPUT-channel axis of
    # the weights to a multiple of 8 so the accumulator tiles are full vregs.
    Mp = _round_up(M2, 128)
    Cp = _round_up(C, 8)
    a_re = jnp.pad(a_re, ((0, 0), (0, 0), (0, Mp - M2)))
    a_im = jnp.pad(a_im, ((0, 0), (0, 0), (0, Mp - M2)))
    w_re = jnp.pad(w_re, ((0, 0), (0, Cp - C), (0, Mp - M2)))
    w_im = jnp.pad(w_im, ((0, 0), (0, Cp - C), (0, Mp - M2)))

    o_re, o_im = spectral_mix(a_re, a_im, w_re, w_im)            # (B, Cp, Mp)
    o = (o_re[:, :C, :M2] + 1j * o_im[:, :C, :M2]).astype(jnp.complex64)

    out_ft = jnp.zeros((B, C, H, Wf), jnp.complex64)
    out_ft = out_ft.at[:, :, :n1, :n2].set(o[..., :M].reshape(B, C, n1, n2))
    out_ft = out_ft.at[:, :, H - n1:, :n2].set(o[..., M:].reshape(B, C, n1, n2))

    spec = jnp.fft.irfftn(out_ft, s=(H, W), axes=(-2, -1))       # (B, C, H, W) f32

    # Fused (spectral + 1x1 conv) -> BN(train) -> ReLU on (B, C, H*W) views:
    # reshapes only, no transposes.
    HW = H * W
    spec_f = spec.reshape(B, C, HW).astype(jnp.float32)
    x_f = x.reshape(B, C, HW).astype(jnp.float32)
    tile_hw = _choose_tile_hw(HW, C)

    # NOTE: the Conv1d bias is a per-channel constant added before training-mode
    # BatchNorm, so it cancels exactly and is omitted from the kernels.
    pre, s1, s2 = pre_and_stats(spec_f, x_f, params["Wc"], tile_hw=tile_hw)

    n_total = float(B * HW)
    mean = s1 / n_total                                          # (C, 1)
    var = jnp.maximum(s2 / n_total - mean * mean, 0.0)           # clamp: cancellation
    inv = jax.lax.rsqrt(var + eps)
    scale = params["gamma"].reshape(C, 1) * inv
    shift = params["beta"].reshape(C, 1) - mean * scale

    y = bn_act(pre, scale, shift, activation=activation, tile_hw=tile_hw)
    return y.reshape(B, C, H, W)


# ----------------------------------------------------------------------------
# Deterministic parameter initialization (shapes as in the PyTorch __init__)
# ----------------------------------------------------------------------------
def init_params(key, width, n_modes):
    n1, n2 = n_modes
    scale = 1.0 / (width * width)
    k1, k2, k3, k4, k5, k6 = jax.random.split(key, 6)
    w1_re = scale * jax.random.uniform(k1, (width, width, n1, n2), jnp.float32)
    w1_im = scale * jax.random.uniform(k2, (width, width, n1, n2), jnp.float32)
    w2_re = scale * jax.random.uniform(k3, (width, width, n1, n2), jnp.float32)
    w2_im = scale * jax.random.uniform(k4, (width, width, n1, n2), jnp.float32)
    kb = 1.0 / (width ** 0.5)                 # Conv1d(width, width, 1) default range
    Wc = jax.random.uniform(k5, (width, width), jnp.float32, -kb, kb)  # (out, in)
    bias = jax.random.uniform(k6, (width,), jnp.float32, -kb, kb)
    gamma = jnp.ones((width,), jnp.float32)   # BatchNorm2d affine init
    beta = jnp.zeros((width,), jnp.float32)
    return dict(w1_re=w1_re, w1_im=w1_im, w2_re=w2_re, w2_im=w2_im,
                Wc=Wc, bias=bias, gamma=gamma, beta=beta)


# ----------------------------------------------------------------------------
# Pure-JAX reference (mirrors the PyTorch module, incl. the conv bias)
# ----------------------------------------------------------------------------
def reference_forward(x, params, *, n_modes, activation=True, eps=1e-5):
    B, C, H, W = x.shape
    n1, n2 = n_modes
    Wf = W // 2 + 1
    hi = jax.lax.Precision.HIGHEST
    x_ft = jnp.fft.rfftn(x, axes=(-2, -1))

    def cmul(a, w_re, w_im):
        ar, ai = jnp.real(a), jnp.imag(a)
        o_re = (jnp.einsum('bixy,ioxy->boxy', ar, w_re, precision=hi)
                - jnp.einsum('bixy,ioxy->boxy', ai, w_im, precision=hi))
        o_im = (jnp.einsum('bixy,ioxy->boxy', ar, w_im, precision=hi)
                + jnp.einsum('bixy,ioxy->boxy', ai, w_re, precision=hi))
        return o_re + 1j * o_im

    out_ft = jnp.zeros((B, C, H, Wf), jnp.complex64)
    out_ft = out_ft.at[:, :, :n1, :n2].set(
        cmul(x_ft[:, :, :n1, :n2], params["w1_re"], params["w1_im"]))
    out_ft = out_ft.at[:, :, H - n1:, :n2].set(
        cmul(x_ft[:, :, H - n1:, :n2], params["w2_re"], params["w2_im"]))
    spec = jnp.fft.irfftn(out_ft, s=(H, W), axes=(-2, -1))

    conv = jnp.einsum('oi,bis->bos', params["Wc"], x.reshape(B, C, -1),
                      precision=hi) + params["bias"][None, :, None]
    pre = spec + conv.reshape(B, C, H, W)

    mean = pre.mean(axis=(0, 2, 3), keepdims=True)
    var = pre.var(axis=(0, 2, 3), keepdims=True)       # biased, like BN training
    y = (pre - mean) * jax.lax.rsqrt(var + eps)
    y = (params["gamma"][None, :, None, None] * y
         + params["beta"][None, :, None, None])
    if activation:
        y = jnp.maximum(y, 0.0)
    return y


if __name__ == "__main__":
    key = jax.random.PRNGKey(0)
    k_x, k_p = jax.random.split(key)

    B, C, H, W = 2, 4, 16, 16           # width=4, spatial 16x16
    n_modes = (8, 8)                    # 2*n1 <= H, n2 <= W//2 + 1 = 9

    x = jax.random.normal(k_x, (B, C, H, W), jnp.float32)
    params = init_params(k_p, C, n_modes)

    fwd = jax.jit(functools.partial(neural_fourier_block2d,
                                    n_modes=n_modes, activation=True))
    out = fwd(x, params)
    jax.block_until_ready(out)
    assert out.shape == (B, C, H, W)

    ref = reference_forward(x, params, n_modes=n_modes, activation=True)
    max_err = float(jnp.max(jnp.abs(out - ref)))
    assert jnp.allclose(out, ref, rtol=5e-3, atol=5e-3), max_err
    print("KERNEL_OK")
</pallas_src>

<mosaic_0001>
module attributes {stable_mosaic.version = 11 : i64} {
  func.func @_spectral_mix_kernel(%arg0: i32, %arg1: memref<2x4x128xf32, #tpu.memory_space<vmem>>, %arg2: memref<2x4x128xf32, #tpu.memory_space<vmem>>, %arg3: memref<4x8x128xf32, #tpu.memory_space<vmem>>, %arg4: memref<4x8x128xf32, #tpu.memory_space<vmem>>, %arg5: memref<2x8x128xf32, #tpu.memory_space<vmem>>, %arg6: memref<2x8x128xf32, #tpu.memory_space<vmem>>) attributes {dimension_semantics = [#tpu.dimension_semantics<parallel>], iteration_bounds = array<i64: 1>, scalar_prefetch = 0 : i64, scratch_operands = 0 : i64, tpu.core_type = #tpu.core_type<tc>, window_params = [{transform_indices = @transform_0, window_bounds = array<i64: 2, 4, 128>}, {transform_indices = @transform_1, window_bounds = array<i64: 2, 4, 128>}, {pipeline_mode = #tpu.pipeline_mode<synchronous>, transform_indices = @transform_2, window_bounds = array<i64: 4, 8, 128>}, {pipeline_mode = #tpu.pipeline_mode<synchronous>, transform_indices = @transform_3, window_bounds = array<i64: 4, 8, 128>}, {transform_indices = @transform_4, window_bounds = array<i64: 2, 8, 128>}, {transform_indices = @transform_5, window_bounds = array<i64: 2, 8, 128>}]} {
    %c0 = arith.constant 0 : index
    %c0_0 = arith.constant 0 : index
    %c0_1 = arith.constant 0 : index
    %0 = vector.load %arg1[%c0, %c0_0, %c0_1] : memref<2x4x128xf32, #tpu.memory_space<vmem>>, vector<2x4x128xf32>
    %c0_2 = arith.constant 0 : index
    %c0_3 = arith.constant 0 : index
    %c0_4 = arith.constant 0 : index
    %1 = vector.load %arg2[%c0_2, %c0_3, %c0_4] : memref<2x4x128xf32, #tpu.memory_space<vmem>>, vector<2x4x128xf32>
    %cst = arith.constant 0.000000e+00 : f32
    %2 = vector.broadcast %cst : f32 to vector<2x8x128xf32>
    %cst_5 = arith.constant 0.000000e+00 : f32
    %3 = vector.broadcast %cst_5 : f32 to vector<2x8x128xf32>
    %4 = vector.extract_strided_slice %0 {offsets = [0, 0, 0], sizes = [2, 1, 128], strides = [1, 1, 1]} : vector<2x4x128xf32> to vector<2x1x128xf32>
    %5 = vector.extract_strided_slice %1 {offsets = [0, 0, 0], sizes = [2, 1, 128], strides = [1, 1, 1]} : vector<2x4x128xf32> to vector<2x1x128xf32>
    %c0_6 = arith.constant 0 : index
    %c0_7 = arith.constant 0 : index
    %c0_8 = arith.constant 0 : index
    %6 = vector.load %arg3[%c0_6, %c0_7, %c0_8] : memref<4x8x128xf32, #tpu.memory_space<vmem>>, vector<1x8x128xf32>
    %7 = vector.shape_cast %6 : vector<1x8x128xf32> to vector<8x128xf32>
    %8 = vector.shape_cast %7 : vector<8x128xf32> to vector<1x8x128xf32>
    %c0_9 = arith.constant 0 : index
    %c0_10 = arith.constant 0 : index
    %c0_11 = arith.constant 0 : index
    %9 = vector.load %arg4[%c0_9, %c0_10, %c0_11] : memref<4x8x128xf32, #tpu.memory_space<vmem>>, vector<1x8x128xf32>
    %10 = vector.shape_cast %9 : vector<1x8x128xf32> to vector<8x128xf32>
    %11 = vector.shape_cast %10 : vector<8x128xf32> to vector<1x8x128xf32>
    %12 = vector.broadcast %4 : vector<2x1x128xf32> to vector<2x8x128xf32>
    %13 = vector.broadcast %8 : vector<1x8x128xf32> to vector<2x8x128xf32>
    %14 = arith.mulf %12, %13 : vector<2x8x128xf32>
    %15 = vector.broadcast %5 : vector<2x1x128xf32> to vector<2x8x128xf32>
    %16 = vector.broadcast %11 : vector<1x8x128xf32> to vector<2x8x128xf32>
    %17 = arith.mulf %15, %16 : vector<2x8x128xf32>
    %18 = arith.subf %14, %17 : vector<2x8x128xf32>
    %19 = arith.addf %2, %18 : vector<2x8x128xf32>
    %20 = vector.broadcast %4 : vector<2x1x128xf32> to vector<2x8x128xf32>
    %21 = vector.broadcast %11 : vector<1x8x128xf32> to vector<2x8x128xf32>
    %22 = arith.mulf %20, %21 : vector<2x8x128xf32>
    %23 = vector.broadcast %5 : vector<2x1x128xf32> to vector<2x8x128xf32>
    %24 = vector.broadcast %8 : vector<1x8x128xf32> to vector<2x8x128xf32>
    %25 = arith.mulf %23, %24 : vector<2x8x128xf32>
    %26 = arith.addf %22, %25 : vector<2x8x128xf32>
    %27 = arith.addf %3, %26 : vector<2x8x128xf32>
    %28 = vector.extract_strided_slice %0 {offsets = [0, 1, 0], sizes = [2, 1, 128], strides = [1, 1, 1]} : vector<2x4x128xf32> to vector<2x1x128xf32>
    %29 = vector.extract_strided_slice %1 {offsets = [0, 1, 0], sizes = [2, 1, 128], strides = [1, 1, 1]} : vector<2x4x128xf32> to vector<2x1x128xf32>
    %c1 = arith.constant 1 : index
    %c0_12 = arith.constant 0 : index
    %c0_13 = arith.constant 0 : index
    %30 = vector.load %arg3[%c1, %c0_12, %c0_13] : memref<4x8x128xf32, #tpu.memory_space<vmem>>, vector<1x8x128xf32>
    %31 = vector.shape_cast %30 : vector<1x8x128xf32> to vector<8x128xf32>
    %32 = vector.shape_cast %31 : vector<8x128xf32> to vector<1x8x128xf32>
    %c1_14 = arith.constant 1 : index
    %c0_15 = arith.constant 0 : index
    %c0_16 = arith.constant 0 : index
    %33 = vector.load %arg4[%c1_14, %c0_15, %c0_16] : memref<4x8x128xf32, #tpu.memory_space<vmem>>, vector<1x8x128xf32>
    %34 = vector.shape_cast %33 : vector<1x8x128xf32> to vector<8x128xf32>
    %35 = vector.shape_cast %34 : vector<8x128xf32> to vector<1x8x128xf32>
    %36 = vector.broadcast %28 : vector<2x1x128xf32> to vector<2x8x128xf32>
    %37 = vector.broadcast %32 : vector<1x8x128xf32> to vector<2x8x128xf32>
    %38 = arith.mulf %36, %37 : vector<2x8x128xf32>
    %39 = vector.broadcast %29 : vector<2x1x128xf32> to vector<2x8x128xf32>
    %40 = vector.broadcast %35 : vector<1x8x128xf32> to vector<2x8x128xf32>
    %41 = arith.mulf %39, %40 : vector<2x8x128xf32>
    %42 = arith.subf %38, %41 : vector<2x8x128xf32>
    %43 = arith.addf %19, %42 : vector<2x8x128xf32>
    %44 = vector.broadcast %28 : vector<2x1x128xf32> to vector<2x8x128xf32>
    %45 = vector.broadcast %35 : vector<1x8x128xf32> to vector<2x8x128xf32>
    %46 = arith.mulf %44, %45 : vector<2x8x128xf32>
    %47 = vector.broadcast %29 : vector<2x1x128xf32> to vector<2x8x128xf32>
    %48 = vector.broadcast %32 : vector<1x8x128xf32> to vector<2x8x128xf32>
    %49 = arith.mulf %47, %48 : vector<2x8x128xf32>
    %50 = arith.addf %46, %49 : vector<2x8x128xf32>
    %51 = arith.addf %27, %50 : vector<2x8x128xf32>
    %52 = vector.extract_strided_slice %0 {offsets = [0, 2, 0], sizes = [2, 1, 128], strides = [1, 1, 1]} : vector<2x4x128xf32> to vector<2x1x128xf32>
    %53 = vector.extract_strided_slice %1 {offsets = [0, 2, 0], sizes = [2, 1, 128], strides = [1, 1, 1]} : vector<2x4x128xf32> to vector<2x1x128xf32>
    %c2 = arith.constant 2 : index
    %c0_17 = arith.constant 0 : index
    %c0_18 = arith.constant 0 : index
    %54 = vector.load %arg3[%c2, %c0_17, %c0_18] : memref<4x8x128xf32, #tpu.memory_space<vmem>>, vector<1x8x128xf32>
    %55 = vector.shape_cast %54 : vector<1x8x128xf32> to vector<8x128xf32>
    %56 = vector.shape_cast %55 : vector<8x128xf32> to vector<1x8x128xf32>
    %c2_19 = arith.constant 2 : index
    %c0_20 = arith.constant 0 : index
    %c0_21 = arith.constant 0 : index
    %57 = vector.load %arg4[%c2_19, %c0_20, %c0_21] : memref<4x8x128xf32, #tpu.memory_space<vmem>>, vector<1x8x128xf32>
    %58 = vector.shape_cast %57 : vector<1x8x128xf32> to vector<8x128xf32>
    %59 = vector.shape_cast %58 : vector<8x128xf32> to vector<1x8x128xf32>
    %60 = vector.broadcast %52 : vector<2x1x128xf32> to vector<2x8x128xf32>
    %61 = vector.broadcast %56 : vector<1x8x128xf32> to vector<2x8x128xf32>
    %62 = arith.mulf %60, %61 : vector<2x8x128xf32>
    %63 = vector.broadcast %53 : vector<2x1x128xf32> to vector<2x8x128xf32>
    %64 = vector.broadcast %59 : vector<1x8x128xf32> to vector<2x8x128xf32>
    %65 = arith.mulf %63, %64 : vector<2x8x128xf32>
    %66 = arith.subf %62, %65 : vector<2x8x128xf32>
    %67 = arith.addf %43, %66 : vector<2x8x128xf32>
    %68 = vector.broadcast %52 : vector<2x1x128xf32> to vector<2x8x128xf32>
    %69 = vector.broadcast %59 : vector<1x8x128xf32> to vector<2x8x128xf32>
    %70 = arith.mulf %68, %69 : vector<2x8x128xf32>
    %71 = vector.broadcast %53 : vector<2x1x128xf32> to vector<2x8x128xf32>
    %72 = vector.broadcast %56 : vector<1x8x128xf32> to vector<2x8x128xf32>
    %73 = arith.mulf %71, %72 : vector<2x8x128xf32>
    %74 = arith.addf %70, %73 : vector<2x8x128xf32>
    %75 = arith.addf %51, %74 : vector<2x8x128xf32>
    %76 = vector.extract_strided_slice %0 {offsets = [0, 3, 0], sizes = [2, 1, 128], strides = [1, 1, 1]} : vector<2x4x128xf32> to vector<2x1x128xf32>
    %77 = vector.extract_strided_slice %1 {offsets = [0, 3, 0], sizes = [2, 1, 128], strides = [1, 1, 1]} : vector<2x4x128xf32> to vector<2x1x128xf32>
    %c3 = arith.constant 3 : index
    %c0_22 = arith.constant 0 : index
    %c0_23 = arith.constant 0 : index
    %78 = vector.load %arg3[%c3, %c0_22, %c0_23] : memref<4x8x128xf32, #tpu.memory_space<vmem>>, vector<1x8x128xf32>
    %79 = vector.shape_cast %78 : vector<1x8x128xf32> to vector<8x128xf32>
    %80 = vector.shape_cast %79 : vector<8x128xf32> to vector<1x8x128xf32>
    %c3_24 = arith.constant 3 : index
    %c0_25 = arith.constant 0 : index
    %c0_26 = arith.constant 0 : index
    %81 = vector.load %arg4[%c3_24, %c0_25, %c0_26] : memref<4x8x128xf32, #tpu.memory_space<vmem>>, vector<1x8x128xf32>
    %82 = vector.shape_cast %81 : vector<1x8x128xf32> to vector<8x128xf32>
    %83 = vector.shape_cast %82 : vector<8x128xf32> to vector<1x8x128xf32>
    %84 = vector.broadcast %76 : vector<2x1x128xf32> to vector<2x8x128xf32>
    %85 = vector.broadcast %80 : vector<1x8x128xf32> to vector<2x8x128xf32>
    %86 = arith.mulf %84, %85 : vector<2x8x128xf32>
    %87 = vector.broadcast %77 : vector<2x1x128xf32> to vector<2x8x128xf32>
    %88 = vector.broadcast %83 : vector<1x8x128xf32> to vector<2x8x128xf32>
    %89 = arith.mulf %87, %88 : vector<2x8x128xf32>
    %90 = arith.subf %86, %89 : vector<2x8x128xf32>
    %91 = arith.addf %67, %90 : vector<2x8x128xf32>
    %92 = vector.broadcast %76 : vector<2x1x128xf32> to vector<2x8x128xf32>
    %93 = vector.broadcast %83 : vector<1x8x128xf32> to vector<2x8x128xf32>
    %94 = arith.mulf %92, %93 : vector<2x8x128xf32>
    %95 = vector.broadcast %77 : vector<2x1x128xf32> to vector<2x8x128xf32>
    %96 = vector.broadcast %80 : vector<1x8x128xf32> to vector<2x8x128xf32>
    %97 = arith.mulf %95, %96 : vector<2x8x128xf32>
    %98 = arith.addf %94, %97 : vector<2x8x128xf32>
    %99 = arith.addf %75, %98 : vector<2x8x128xf32>
    %c0_27 = arith.constant 0 : index
    %c0_28 = arith.constant 0 : index
    %c0_29 = arith.constant 0 : index
    %100 = vector.load %arg5[%c0_27, %c0_28, %c0_29] : memref<2x8x128xf32, #tpu.memory_space<vmem>>, vector<2x8x128xf32>
    tpu.vector_store %arg5[%c0_27, %c0_28, %c0_29], %91 {strides = array<i32>} : memref<2x8x128xf32, #tpu.memory_space<vmem>>, vector<2x8x128xf32>,
    %c0_30 = arith.constant 0 : index
    %c0_31 = arith.constant 0 : index
    %c0_32 = arith.constant 0 : index
    %101 = vector.load %arg6[%c0_30, %c0_31, %c0_32] : memref<2x8x128xf32, #tpu.memory_space<vmem>>, vector<2x8x128xf32>
    tpu.vector_store %arg6[%c0_30, %c0_31, %c0_32], %99 {strides = array<i32>} : memref<2x8x128xf32, #tpu.memory_space<vmem>>, vector<2x8x128xf32>,
    return
  }
  func.func @transform_0(%arg0: i32) -> (i32, i32, i32) {
    %c0_i32 = arith.constant 0 : i32
    %c0_i32_0 = arith.constant 0 : i32
    %c0_i32_1 = arith.constant 0 : i32
    return %arg0, %c0_i32, %c0_i32_0 : i32, i32, i32
  }
  func.func @transform_1(%arg0: i32) -> (i32, i32, i32) {
    %c0_i32 = arith.constant 0 : i32
    %c0_i32_0 = arith.constant 0 : i32
    %c0_i32_1 = arith.constant 0 : i32
    return %arg0, %c0_i32, %c0_i32_0 : i32, i32, i32
  }
  func.func @transform_2(%arg0: i32) -> (i32, i32, i32) {
    %c0_i32 = arith.constant 0 : i32
    %c0_i32_0 = arith.constant 0 : i32
    %c0_i32_1 = arith.constant 0 : i32
    %c0_i32_2 = arith.constant 0 : i32
    return %c0_i32, %c0_i32_0, %c0_i32_1 : i32, i32, i32
  }
  func.func @transform_3(%arg0: i32) -> (i32, i32, i32) {
    %c0_i32 = arith.constant 0 : i32
    %c0_i32_0 = arith.constant 0 : i32
    %c0_i32_1 = arith.constant 0 : i32
    %c0_i32_2 = arith.constant 0 : i32
    return %c0_i32, %c0_i32_0, %c0_i32_1 : i32, i32, i32
  }
  func.func @transform_4(%arg0: i32) -> (i32, i32, i32) {
    %c0_i32 = arith.constant 0 : i32
    %c0_i32_0 = arith.constant 0 : i32
    %c0_i32_1 = arith.constant 0 : i32
    return %arg0, %c0_i32, %c0_i32_0 : i32, i32, i32
  }
  func.func @transform_5(%arg0: i32) -> (i32, i32, i32) {
    %c0_i32 = arith.constant 0 : i32
    %c0_i32_0 = arith.constant 0 : i32
    %c0_i32_1 = arith.constant 0 : i32
    return %arg0, %c0_i32, %c0_i32_0 : i32, i32, i32
  }
}

module attributes {stable_mosaic.version = 11 : i64} {
  func.func @_pre_stats_kernel(%arg0: i32, %arg1: i32, %arg2: memref<1x4x256xf32, #tpu.memory_space<vmem>>, %arg3: memref<1x4x256xf32, #tpu.memory_space<vmem>>, %arg4: memref<4x4xf32, #tpu.memory_space<vmem>>, %arg5: memref<1x4x256xf32, #tpu.memory_space<vmem>>, %arg6: memref<4x1xf32, #tpu.memory_space<vmem>>, %arg7: memref<4x1xf32, #tpu.memory_space<vmem>>) attributes {dimension_semantics = [#tpu.dimension_semantics<arbitrary>, #tpu.dimension_semantics<arbitrary>], iteration_bounds = array<i64: 2, 1>, scalar_prefetch = 0 : i64, scratch_operands = 0 : i64, tpu.core_type = #tpu.core_type<tc>, window_params = [{transform_indices = @transform_0, window_bounds = array<i64: 1, 4, 256>}, {transform_indices = @transform_1, window_bounds = array<i64: 1, 4, 256>}, {pipeline_mode = #tpu.pipeline_mode<synchronous>, transform_indices = @transform_2, window_bounds = array<i64: 4, 4>}, {transform_indices = @transform_3, window_bounds = array<i64: 1, 4, 256>}, {pipeline_mode = #tpu.pipeline_mode<synchronous>, transform_indices = @transform_4, window_bounds = array<i64: 4, 1>}, {pipeline_mode = #tpu.pipeline_mode<synchronous>, transform_indices = @transform_5, window_bounds = array<i64: 4, 1>}]} {
    %c0_i32 = arith.constant 0 : i32
    %0 = arith.cmpi eq, %arg0, %c0_i32 : i32
    %c0_i32_0 = arith.constant 0 : i32
    %1 = arith.cmpi eq, %arg1, %c0_i32_0 : i32
    %2 = arith.andi %0, %1 : i1
    %3 = arith.extui %2 : i1 to i32
    %c0_i32_1 = arith.constant 0 : i32
    %4 = arith.cmpi ne, %3, %c0_i32_1 : i32
    scf.if %4 {
      %cst_22 = arith.constant 0.000000e+00 : f32
      %26 = vector.broadcast %cst_22 : f32 to vector<4x1xf32>
      %c0_23 = arith.constant 0 : index
      %c0_24 = arith.constant 0 : index
      %27 = vector.load %arg6[%c0_23, %c0_24] : memref<4x1xf32, #tpu.memory_space<vmem>>, vector<4x1xf32>
      tpu.vector_store %arg6[%c0_23, %c0_24], %26 {strides = array<i32>} : memref<4x1xf32, #tpu.memory_space<vmem>>, vector<4x1xf32>,
      %cst_25 = arith.constant 0.000000e+00 : f32
      %28 = vector.broadcast %cst_25 : f32 to vector<4x1xf32>
      %c0_26 = arith.constant 0 : index
      %c0_27 = arith.constant 0 : index
      %29 = vector.load %arg7[%c0_26, %c0_27] : memref<4x1xf32, #tpu.memory_space<vmem>>, vector<4x1xf32>
      tpu.vector_store %arg7[%c0_26, %c0_27], %28 {strides = array<i32>} : memref<4x1xf32, #tpu.memory_space<vmem>>, vector<4x1xf32>,
    } else {
    }
    %c0 = arith.constant 0 : index
    %c0_2 = arith.constant 0 : index
    %c0_3 = arith.constant 0 : index
    %5 = vector.load %arg2[%c0, %c0_2, %c0_3] : memref<1x4x256xf32, #tpu.memory_space<vmem>>, vector<1x4x256xf32>
    %6 = vector.shape_cast %5 : vector<1x4x256xf32> to vector<4x256xf32>
    %c0_4 = arith.constant 0 : index
    %c0_5 = arith.constant 0 : index
    %7 = vector.load %arg4[%c0_4, %c0_5] : memref<4x4xf32, #tpu.memory_space<vmem>>, vector<4x4xf32>
    %c0_6 = arith.constant 0 : index
    %c0_7 = arith.constant 0 : index
    %c0_8 = arith.constant 0 : index
    %8 = vector.load %arg3[%c0_6, %c0_7, %c0_8] : memref<1x4x256xf32, #tpu.memory_space<vmem>>, vector<1x4x256xf32>
    %9 = vector.shape_cast %8 : vector<1x4x256xf32> to vector<4x256xf32>
    %cst = arith.constant dense<0.000000e+00> : vector<4x256xf32>
    %10 = tpu.matmul %7, %9, %cst {dimension_numbers = #tpu.dot_dimension_numbers<[1], [0], [0], [1], [0, 0, 1, 1], [], []>} : vector<4x4xf32>, vector<4x256xf32>, vector<4x256xf32> -> vector<4x256xf32>
    %11 = arith.addf %6, %10 : vector<4x256xf32>
    %c0_9 = arith.constant 0 : index
    %c0_10 = arith.constant 0 : index
    %c0_11 = arith.constant 0 : index
    %12 = vector.load %arg5[%c0_9, %c0_10, %c0_11] : memref<1x4x256xf32, #tpu.memory_space<vmem>>, vector<1x4x256xf32>
    %13 = vector.shape_cast %12 : vector<1x4x256xf32> to vector<4x256xf32>
    %14 = vector.shape_cast %11 : vector<4x256xf32> to vector<1x4x256xf32>
    tpu.vector_store %arg5[%c0_9, %c0_10, %c0_11], %14 {strides = array<i32>} : memref<1x4x256xf32, #tpu.memory_space<vmem>>, vector<1x4x256xf32>,
    %c0_12 = arith.constant 0 : index
    %c0_13 = arith.constant 0 : index
    %15 = vector.load %arg6[%c0_12, %c0_13] : memref<4x1xf32, #tpu.memory_space<vmem>>, vector<4x1xf32>
    %cst_14 = arith.constant dense<0.000000e+00> : vector<4xf32>
    %16 = vector.multi_reduction <add>, %11, %cst_14 [1] : vector<4x256xf32> to vector<4xf32>
    %17 = vector.shape_cast %16 : vector<4xf32> to vector<4x1xf32>
    %18 = arith.addf %15, %17 : vector<4x1xf32>
    %c0_15 = arith.constant 0 : index
    %c0_16 = arith.constant 0 : index
    %19 = vector.load %arg6[%c0_15, %c0_16] : memref<4x1xf32, #tpu.memory_space<vmem>>, vector<4x1xf32>
    tpu.vector_store %arg6[%c0_15, %c0_16], %18 {strides = array<i32>} : memref<4x1xf32, #tpu.memory_space<vmem>>, vector<4x1xf32>,
    %c0_17 = arith.constant 0 : index
    %c0_18 = arith.constant 0 : index
    %20 = vector.load %arg7[%c0_17, %c0_18] : memref<4x1xf32, #tpu.memory_space<vmem>>, vector<4x1xf32>
    %21 = arith.mulf %11, %11 : vector<4x256xf32>
    %cst_19 = arith.constant dense<0.000000e+00> : vector<4xf32>
    %22 = vector.multi_reduction <add>, %21, %cst_19 [1] : vector<4x256xf32> to vector<4xf32>
    %23 = vector.shape_cast %22 : vector<4xf32> to vector<4x1xf32>
    %24 = arith.addf %20, %23 : vector<4x1xf32>
    %c0_20 = arith.constant 0 : index
    %c0_21 = arith.constant 0 : index
    %25 = vector.load %arg7[%c0_20, %c0_21] : memref<4x1xf32, #tpu.memory_space<vmem>>, vector<4x1xf32>
    tpu.vector_store %arg7[%c0_20, %c0_21], %24 {strides = array<i32>} : memref<4x1xf32, #tpu.memory_space<vmem>>, vector<4x1xf32>,
    return
  }
  func.func @transform_0(%arg0: i32, %arg1: i32) -> (i32, i32, i32) {
    %c0_i32 = arith.constant 0 : i32
    %c0_i32_0 = arith.constant 0 : i32
    return %arg0, %c0_i32, %arg1 : i32, i32, i32
  }
  func.func @transform_1(%arg0: i32, %arg1: i32) -> (i32, i32, i32) {
    %c0_i32 = arith.constant 0 : i32
    %c0_i32_0 = arith.constant 0 : i32
    return %arg0, %c0_i32, %arg1 : i32, i32, i32
  }
  func.func @transform_2(%arg0: i32, %arg1: i32) -> (i32, i32) {
    %c0_i32 = arith.constant 0 : i32
    %c0_i32_0 = arith.constant 0 : i32
    %c0_i32_1 = arith.constant 0 : i32
    return %c0_i32, %c0_i32_0 : i32, i32
  }
  func.func @transform_3(%arg0: i32, %arg1: i32) -> (i32, i32, i32) {
    %c0_i32 = arith.constant 0 : i32
    %c0_i32_0 = arith.constant 0 : i32
    return %arg0, %c0_i32, %arg1 : i32, i32, i32
  }
  func.func @transform_4(%arg0: i32, %arg1: i32) -> (i32, i32) {
    %c0_i32 = arith.constant 0 : i32
    %c0_i32_0 = arith.constant 0 : i32
    %c0_i32_1 = arith.constant 0 : i32
    return %c0_i32, %c0_i32_0 : i32, i32
  }
  func.func @transform_5(%arg0: i32, %arg1: i32) -> (i32, i32) {
    %c0_i32 = arith.constant 0 : i32
    %c0_i32_0 = arith.constant 0 : i32
    %c0_i32_1 = arith.constant 0 : i32
    return %c0_i32, %c0_i32_0 : i32, i32
  }
}

module attributes {stable_mosaic.version = 11 : i64} {
  func.func @_bn_act_kernel(%arg0: i32, %arg1: i32, %arg2: memref<1x4x256xf32, #tpu.memory_space<vmem>>, %arg3: memref<4x1xf32, #tpu.memory_space<vmem>>, %arg4: memref<4x1xf32, #tpu.memory_space<vmem>>, %arg5: memref<1x4x256xf32, #tpu.memory_space<vmem>>) attributes {dimension_semantics = [#tpu.dimension_semantics<parallel>, #tpu.dimension_semantics<parallel>], iteration_bounds = array<i64: 2, 1>, scalar_prefetch = 0 : i64, scratch_operands = 0 : i64, tpu.core_type = #tpu.core_type<tc>, window_params = [{transform_indices = @transform_0, window_bounds = array<i64: 1, 4, 256>}, {pipeline_mode = #tpu.pipeline_mode<synchronous>, transform_indices = @transform_1, window_bounds = array<i64: 4, 1>}, {pipeline_mode = #tpu.pipeline_mode<synchronous>, transform_indices = @transform_2, window_bounds = array<i64: 4, 1>}, {transform_indices = @transform_3, window_bounds = array<i64: 1, 4, 256>}]} {
    %c0 = arith.constant 0 : index
    %c0_0 = arith.constant 0 : index
    %c0_1 = arith.constant 0 : index
    %0 = vector.load %arg2[%c0, %c0_0, %c0_1] : memref<1x4x256xf32, #tpu.memory_space<vmem>>, vector<1x4x256xf32>
    %1 = vector.shape_cast %0 : vector<1x4x256xf32> to vector<4x256xf32>
    %c0_2 = arith.constant 0 : index
    %c0_3 = arith.constant 0 : index
    %2 = vector.load %arg3[%c0_2, %c0_3] : memref<4x1xf32, #tpu.memory_space<vmem>>, vector<4x1xf32>
    %3 = vector.broadcast %2 : vector<4x1xf32> to vector<4x256xf32>
    %4 = arith.mulf %1, %3 : vector<4x256xf32>
    %c0_4 = arith.constant 0 : index
    %c0_5 = arith.constant 0 : index
    %5 = vector.load %arg4[%c0_4, %c0_5] : memref<4x1xf32, #tpu.memory_space<vmem>>, vector<4x1xf32>
    %6 = vector.broadcast %5 : vector<4x1xf32> to vector<4x256xf32>
    %7 = arith.addf %4, %6 : vector<4x256xf32>
    %cst = arith.constant 0.000000e+00 : f32
    %8 = vector.broadcast %cst : f32 to vector<4x256xf32>
    %9 = arith.maximumf %7, %8 : vector<4x256xf32>
    %c0_6 = arith.constant 0 : index
    %c0_7 = arith.constant 0 : index
    %c0_8 = arith.constant 0 : index
    %10 = vector.load %arg5[%c0_6, %c0_7, %c0_8] : memref<1x4x256xf32, #tpu.memory_space<vmem>>, vector<1x4x256xf32>
    %11 = vector.shape_cast %10 : vector<1x4x256xf32> to vector<4x256xf32>
    %12 = vector.shape_cast %9 : vector<4x256xf32> to vector<1x4x256xf32>
    tpu.vector_store %arg5[%c0_6, %c0_7, %c0_8], %12 {strides = array<i32>} : memref<1x4x256xf32, #tpu.memory_space<vmem>>, vector<1x4x256xf32>,
    return
  }
  func.func @transform_0(%arg0: i32, %arg1: i32) -> (i32, i32, i32) {
    %c0_i32 = arith.constant 0 : i32
    %c0_i32_0 = arith.constant 0 : i32
    return %arg0, %c0_i32, %arg1 : i32, i32, i32
  }
  func.func @transform_1(%arg0: i32, %arg1: i32) -> (i32, i32) {
    %c0_i32 = arith.constant 0 : i32
    %c0_i32_0 = arith.constant 0 : i32
    %c0_i32_1 = arith.constant 0 : i32
    return %c0_i32, %c0_i32_0 : i32, i32
  }
  func.func @transform_2(%arg0: i32, %arg1: i32) -> (i32, i32) {
    %c0_i32 = arith.constant 0 : i32
    %c0_i32_0 = arith.constant 0 : i32
    %c0_i32_1 = arith.constant 0 : i32
    return %c0_i32, %c0_i32_0 : i32, i32
  }
  func.func @transform_3(%arg0: i32, %arg1: i32) -> (i32, i32, i32) {
    %c0_i32 = arith.constant 0 : i32
    %c0_i32_0 = arith.constant 0 : i32
    return %arg0, %c0_i32, %arg1 : i32, i32, i32
  }
}

</mosaic_0001>

<bundles_post_ra>
// kernel: neural_fourier_block2d.3
= control target key start
LH: loop header
LB: loop body
LE: loop exit
PB: predicated region body
PF: predicated region fallthrough
CT: control target
= control target key end

     0   :  { %v25_v0 = vlaneseq  ;;  %s309_s0 = inlined_call_operand.vmem [shape: f32[2,4,128], index: 0, kind: input, shape index: {}]   ;;  %s310_s1 = inlined_call_operand.vmem [shape: f32[2,4,128], index: 1, kind: input, shape index: {}]   ;;  %s311_s2 = inlined_call_operand.vmem [shape: f32[4,8,128], index: 2, kind: input, shape index: {}]   ;;  %s312_s3 = inlined_call_operand.vmem [shape: f32[4,8,128], index: 3, kind: input, shape index: {}]   ;;  %s313_s4 = inlined_call_operand.vmem [shape: f32[2,8,128], index: 4, kind: output, shape index: {0}]   ;;  %s314_s5 = inlined_call_operand.vmem [shape: f32[2,8,128], index: 5, kind: output, shape index: {1}]  }
   0x1   :  { %v19_v2 = vld [vmem:[%s309_s0] sm:$0xf]  ;;  %v232_v10 = vld [vmem:[%s311_s2 + $0x8] sm:$0xff]  ;;  %v242_v12 = vld [vmem:[%s311_s2 + $0x10] sm:$0xff] }
   0x2   :  { %v26_v1 = vshrl.u32 %v25_v0, 7  ;;  %v21_v3 = vld [vmem:[%s310_s1] sm:$0xf]  ;;  %v237_v11 = vld [vmem:[%s312_s3 + $0x8] sm:$0xff]  ;;  %v247_v17 = vld [vmem:[%s312_s3 + $0x10] sm:$0xff] }
   0x3   :  { %v222_v4 = vld [vmem:[%s311_s2] sm:$0xff]  ;;  %v252_v18 = vld [vmem:[%s311_s2 + $0x18] sm:$0xff] }
   0x4   :  { %v227_v5 = vld [vmem:[%s312_s3] sm:$0xff]  ;;  %v27_v6 = vsub.s32 0, %v26_v1  ;;  %v63_v7 = vsub.s32 1, %v26_v1  ;;  %v99_v8 = vsub.s32 2, %v26_v1  ;;  %v135_v9 = vsub.s32 3, %v26_v1  ;;  %v257_v19 = vld [vmem:[%s312_s3 + $0x18] sm:$0xff] }
   0x5   :  { %v20_v24 = vld [vmem:[%s309_s0 + $0x4] sm:$0xf] }
   0x6   :  { %v28_v13 = vrot.slane %v19_v2, %v27_v6  ;;  %v38_v14 = vrot.slane %v21_v3, %v27_v6  ;;  %v64_v15 = vrot.slane %v19_v2, %v63_v7  ;;  %v74_v16 = vrot.slane %v21_v3, %v63_v7  ;;  %v22_v25 = vld [vmem:[%s310_s1 + $0x4] sm:$0xf] }
   0x7   :  { %v100_v20 = vrot.slane %v19_v2, %v99_v8  ;;  %v110_v21 = vrot.slane %v21_v3, %v99_v8  ;;  %v136_v22 = vrot.slane %v19_v2, %v135_v9  ;;  %v146_v23 = vrot.slane %v21_v3, %v135_v9 }
   0x8   :  { %v33_v26 = vmul.f32 %v28_v13, %v222_v4  ;;  %v43_v27 = vmul.f32 %v38_v14, %v227_v5  ;;  %v69_v28 = vmul.f32 %v232_v10, %v64_v15  ;;  %v79_v29 = vmul.f32 %v237_v11, %v74_v16 }
   0x9   :  { %v105_v30 = vmul.f32 %v242_v12, %v100_v20  ;;  %v115_v31 = vmul.f32 %v247_v17, %v110_v21  ;;  %v141_v32 = vmul.f32 %v252_v18, %v136_v22  ;;  %v151_v33 = vmul.f32 %v257_v19, %v146_v23 }
   0xa   :  { %v45_v34 = vsub.f32 %v33_v26, %v43_v27  ;;  %v81_v35 = vsub.f32 %v69_v28, %v79_v29  ;;  %v32_v36 = vrot.slane %v20_v24, %v27_v6  ;;  %v42_v37 = vrot.slane %v22_v25, %v27_v6 }
   0xb   :  { %v117_v38 = vsub.f32 %v105_v30, %v115_v31  ;;  %v153_v39 = vsub.f32 %v141_v32, %v151_v33  ;;  %v68_v40 = vrot.slane %v20_v24, %v63_v7  ;;  %v78_v41 = vrot.slane %v22_v25, %v63_v7 }
   0xc   :  { %v83_v42 = vadd.f32 %v81_v35, %v45_v34  ;;  %v34_v43 = vmul.f32 %v32_v36, %v222_v4  ;;  %v44_v44 = vmul.f32 %v42_v37, %v227_v5  ;;  %v104_v45 = vrot.slane %v20_v24, %v99_v8 }
   0xd   :  { %v70_v46 = vmul.f32 %v232_v10, %v68_v40  ;;  %v80_v47 = vmul.f32 %v237_v11, %v78_v41  ;;  %v114_v48 = vrot.slane %v22_v25, %v99_v8  ;;  %v140_v49 = vrot.slane %v20_v24, %v135_v9 }
   0xe   :  { %v119_v50 = vadd.f32 %v117_v38, %v83_v42  ;;  %v46_v51 = vsub.f32 %v34_v43, %v44_v44  ;;  %v106_v52 = vmul.f32 %v242_v12, %v104_v45  ;;  %v150_v53 = vrot.slane %v22_v25, %v135_v9 }
   0xf   :  { %v82_v54 = vsub.f32 %v70_v46, %v80_v47  ;;  %v116_v55 = vmul.f32 %v247_v17, %v114_v48  ;;  %v142_v56 = vmul.f32 %v252_v18, %v140_v49  ;;  %v49_v57 = vmul.f32 %v28_v13, %v227_v5 }
  0x10   :  { %v155_v58 = vadd.f32 %v153_v39, %v119_v50  ;;  %v152_v59 = vmul.f32 %v257_v19, %v150_v53  ;;  %v51_v60 = vmul.f32 %v38_v14, %v222_v4  ;;  %v85_v61 = vmul.f32 %v237_v11, %v64_v15 }
  0x11   :  { %v84_v62 = vadd.f32 %v82_v54, %v46_v51  ;;  %v118_v63 = vsub.f32 %v106_v52, %v116_v55  ;;  %v87_v0 = vmul.f32 %v232_v10, %v74_v16  ;;  %v121_v1 = vmul.f32 %v247_v17, %v100_v20 }
  0x12   :  { %165 = vst [vmem:[%s313_s4] sm:$0xff] %v155_v58  ;;  %v154_v2 = vsub.f32 %v142_v56, %v152_v59  ;;  %v53_v3 = vadd.f32 %v51_v60, %v49_v57  ;;  %v123_v6 = vmul.f32 %v242_v12, %v110_v21  ;;  %v157_v7 = vmul.f32 %v257_v19, %v136_v22 }
  0x13   :  { %v120_v8 = vadd.f32 %v118_v63, %v84_v62  ;;  %v89_v9 = vadd.f32 %v87_v0, %v85_v61  ;;  %v159_v13 = vmul.f32 %v252_v18, %v146_v23  ;;  %v50_v14 = vmul.f32 %v32_v36, %v227_v5 }
  0x14   :  { %v125_v15 = vadd.f32 %v123_v6, %v121_v1  ;;  %v52_v16 = vmul.f32 %v42_v37, %v222_v4  ;;  %v86_v20 = vmul.f32 %v237_v11, %v68_v40  ;;  %v88_v24 = vmul.f32 %v232_v10, %v78_v41 }
  0x15   :  { %v156_v25 = vadd.f32 %v154_v2, %v120_v8  ;;  %v91_v26 = vadd.f32 %v89_v9, %v53_v3  ;;  %v161_v27 = vadd.f32 %v159_v13, %v157_v7  ;;  %v122_v21 = vmul.f32 %v247_v17, %v104_v45 }
  0x16   :  { %v54_v28 = vadd.f32 %v52_v16, %v50_v14  ;;  %v90_v22 = vadd.f32 %v88_v24, %v86_v20  ;;  %v124_v29 = vmul.f32 %v242_v12, %v114_v48  ;;  %v158_v23 = vmul.f32 %v257_v19, %v140_v49 }
  0x17   :  { %166 = vst [vmem:[%s313_s4 + $0x8] sm:$0xff] %v156_v25  ;;  %v127_v4 = vadd.f32 %v125_v15, %v91_v26  ;;  %v160_v5 = vmul.f32 %v252_v18, %v150_v53 }
  0x18   :  { %v92_v11 = vadd.f32 %v90_v22, %v54_v28  ;;  %v126_v10 = vadd.f32 %v124_v29, %v122_v21 }
  0x19   :  { %v163_v30 = vadd.f32 %v161_v27, %v127_v4  ;;  %v162_v31 = vadd.f32 %v160_v5, %v158_v23 }
  0x1a   :  { %v128_v32 = vadd.f32 %v126_v10, %v92_v11 }
  0x1b   :  { %167 = vst [vmem:[%s314_s5] sm:$0xff] %v163_v30 }
  0x1c   :  { %v164_v17 = vadd.f32 %v162_v31, %v128_v32 }
  0x1e   :  { %168 = vst [vmem:[%s314_s5 + $0x8] sm:$0xff] %v164_v17 }

// kernel: reverse.0
= control target key start
LH: loop header
LB: loop body
LE: loop exit
PB: predicated region body
PF: predicated region fallthrough
CT: control target
= control target key end

     0   :  { %v72_v3 = vlaneseq  ;;  %v65_v9 = vld [vmem:[#allocation0 + $0x7] ss:$-1 sm:$0xff]  ;;  %v79_v12 = vld [vmem:[#allocation0 + $0x17] ss:$-1 sm:$0xff]  ;;  %s331_s0 = inlined_call_operand.vmem [shape: f32[2,4,16,7], index: 0, kind: input, shape index: {}]   ;;  %s332_s1 = inlined_call_operand.vmem [shape: f32[2,4,16,7], index: 1, kind: output, shape index: {}]  }
   0x1   :  { %v45_v0 = vld [vmem:[%s331_s0] sm:$0xff]  ;;  %v47_v1 = vld [vmem:[%s331_s0 + $0x8] sm:$0xff]  ;;  %v49_v2 = vld [vmem:[%s331_s0 + $0x10] sm:$0xff]  ;;  %v66_v10 = vrot.slane %v65_v9, 1  ;;  %v80_v14 = vrot.slane %v79_v12, 1 }
   0x2   :  { %46 = vst [vmem:[#allocation0 + $0x8] sm:$0xff] %v45_v0  ;;  %48 = vst [vmem:[#allocation0 + $0x18] sm:$0xff] %v47_v1  ;;  %v51_v4 = vld [vmem:[%s331_s0 + $0x18] sm:$0xff]  ;;  %v53_v5 = vld [vmem:[%s331_s0 + $0x20] sm:$0xff]  ;;  %v73_v11 = vshrl.u32 %v72_v3, 7 }
   0x3   :  { %50 = vst [vmem:[#allocation0 + $0x28] sm:$0xff] %v49_v2  ;;  %v55_v6 = vld [vmem:[%s331_s0 + $0x28] sm:$0xff]  ;;  %52 = vst [vmem:[#allocation0 + $0x38] sm:$0xff] %v51_v4  ;;  %v57_v7 = vld [vmem:[%s331_s0 + $0x30] sm:$0xff] }
   0x4   :  { %54 = vst [vmem:[#allocation0 + $0x48] sm:$0xff] %v53_v5  ;;  %56 = vst [vmem:[#allocation0 + $0x58] sm:$0xff] %v55_v6  ;;  %v59_v8 = vld [vmem:[%s331_s0 + $0x38] sm:$0xff]  ;;  %v93_v13 = vld [vmem:[#allocation0 + $0x27] ss:$-1 sm:$0xff]  ;;  %vm74_vm0 = vcmp.lt.s32.totalorder %v73_v11, 7 }
   0x5   :  { %58 = vst [vmem:[#allocation0 + $0x68] sm:$0xff] %v57_v7  ;;  %60 = vst [vmem:[#allocation0 + $0x78] sm:$0xff] %v59_v8  ;;  %v94_v15 = vrot.slane %v93_v13, 1  ;;  %v107_v16 = vld [vmem:[#allocation0 + $0x37] ss:$-1 sm:$0xff] }
   0x6   :  { %67 = vst [vmem:[#allocation1] sm:$0xff] %v66_v10  ;;  %v108_v17 = vrot.slane %v107_v16, 1  ;;  %v121_v18 = vld [vmem:[#allocation0 + $0x47] ss:$-1 sm:$0xff]  ;;  %v135_v19 = vld [vmem:[#allocation0 + $0x57] ss:$-1 sm:$0xff] }
   0x7   :  { %81 = vst [vmem:[#allocation1 + $0x8] sm:$0xff] %v80_v14  ;;  %95 = vst [vmem:[#allocation1 + $0x10] sm:$0xff] %v94_v15  ;;  %v122_v20 = vrot.slane %v121_v18, 1  ;;  %v136_v21 = vrot.slane %v135_v19, 1  ;;  %v149_v22 = vld [vmem:[#allocation0 + $0x67] ss:$-1 sm:$0xff] }
   0x8   :  { %v163_v23 = vld [vmem:[#allocation0 + $0x77] ss:$-1 sm:$0xff]  ;;  %109 = vst [vmem:[#allocation1 + $0x18] sm:$0xff] %v108_v17  ;;  %v150_v24 = vrot.slane %v149_v22, 1 }
   0x9   :  { %v164_v25 = vrot.slane %v163_v23, 1  ;;  %v70_v26 = vld [vmem:[#allocation0 + $0xf] ss:$-1 sm:$0xff]  ;;  %v84_v27 = vld [vmem:[#allocation0 + $0x1f] ss:$-1 sm:$0xff]  ;;  %123 = vst [vmem:[#allocation1 + $0x20] sm:$0xff] %v122_v20 }
   0xa   :  { %v98_v28 = vld [vmem:[#allocation0 + $0x2f] ss:$-1 sm:$0xff]  ;;  %137 = vst [vmem:[#allocation1 + $0x28] sm:$0xff] %v136_v21  ;;  %v71_v29 = vrot.slane %v70_v26, 1  ;;  %v85_v30 = vrot.slane %v84_v27, 1  ;;  %151 = vst [vmem:[#allocation1 + $0x30] sm:$0xff] %v150_v24 }
   0xb   :  { %v99_v31 = vrot.slane %v98_v28, 1  ;;  %v112_v32 = vld [vmem:[#allocation0 + $0x3f] ss:$-1 sm:$0xff]  ;;  %165 = vst [vmem:[#allocation1 + $0x38] sm:$0xff] %v164_v25  ;;  %v126_v34 = vld [vmem:[#allocation0 + $0x4f] ss:$-1 sm:$0xff] }
   0xc   :  { %v113_v33 = vrot.slane %v112_v32, 1  ;;  %v140_v35 = vld [vmem:[#allocation0 + $0x5f] ss:$-1 sm:$0xff]  ;;  %75 = vst.msk [vmem:[#allocation1] sm:$0xff] %vm74_vm0, %v71_v29  ;;  %89 = vst.msk [vmem:[#allocation1 + $0x8] sm:$0xff] %vm74_vm0, %v85_v30  ;;  %v127_v36 = vrot.slane %v126_v34, 1 }
   0xd   :  { %103 = vst.msk [vmem:[#allocation1 + $0x10] sm:$0xff] %vm74_vm0, %v99_v31  ;;  %v141_v37 = vrot.slane %v140_v35, 1  ;;  %v154_v38 = vld [vmem:[#allocation0 + $0x6f] ss:$-1 sm:$0xff]  ;;  %v168_v39 = vld [vmem:[#allocation0 + $0x7f] ss:$-1 sm:$0xff] }
   0xe   :  { %117 = vst.msk [vmem:[#allocation1 + $0x18] sm:$0xff] %vm74_vm0, %v113_v33  ;;  %v155_v40 = vrot.slane %v154_v38, 1  ;;  %v169_v41 = vrot.slane %v168_v39, 1  ;;  %131 = vst.msk [vmem:[#allocation1 + $0x20] sm:$0xff] %vm74_vm0, %v127_v36 }
   0xf   :  { %145 = vst.msk [vmem:[#allocation1 + $0x28] sm:$0xff] %vm74_vm0, %v141_v37 }
  0x10   :  { %159 = vst.msk [vmem:[#allocation1 + $0x30] sm:$0xff] %vm74_vm0, %v155_v40  ;;  %173 = vst.msk [vmem:[#allocation1 + $0x38] sm:$0xff] %vm74_vm0, %v169_v41 }
  0x13   :  { %v216_v42 = vld [vmem:[#allocation1] sm:$0xff]  ;;  %v218_v43 = vld [vmem:[#allocation1 + $0x8] sm:$0xff] }
  0x14   :  { %v220_v44 = vld [vmem:[#allocation1 + $0x10] sm:$0xff]  ;;  %217 = vst [vmem:[%s332_s1] sm:$0xff] %v216_v42  ;;  %219 = vst [vmem:[%s332_s1 + $0x8] sm:$0xff] %v218_v43 }
  0x15   :  { %221 = vst [vmem:[%s332_s1 + $0x10] sm:$0xff] %v220_v44  ;;  %v222_v45 = vld [vmem:[#allocation1 + $0x18] sm:$0xff]  ;;  %v224_v46 = vld [vmem:[#allocation1 + $0x20] sm:$0xff] }
  0x16   :  { %223 = vst [vmem:[%s332_s1 + $0x18] sm:$0xff] %v222_v45  ;;  %v226_v47 = vld [vmem:[#allocation1 + $0x28] sm:$0xff]  ;;  %225 = vst [vmem:[%s332_s1 + $0x20] sm:$0xff] %v224_v46 }
  0x17   :  { %227 = vst [vmem:[%s332_s1 + $0x28] sm:$0xff] %v226_v47  ;;  %v228_v48 = vld [vmem:[#allocation1 + $0x30] sm:$0xff]  ;;  %v230_v49 = vld [vmem:[#allocation1 + $0x38] sm:$0xff] }
  0x18   :  { %229 = vst [vmem:[%s332_s1 + $0x30] sm:$0xff] %v228_v48  ;;  %231 = vst [vmem:[%s332_s1 + $0x38] sm:$0xff] %v230_v49 }

// kernel: neural_fourier_block2d.4
= control target key start
LH: loop header
LB: loop body
LE: loop exit
PB: predicated region body
PF: predicated region fallthrough
CT: control target
= control target key end

     0   :  { %s640_s18 = smov 0   ;;  %s642_s19 = smov 0   ;;  %s703_s0 = inlined_call_operand.vmem [shape: f32[2,4,256], index: 0, kind: input, shape index: {}]   ;;  %s704_s1 = inlined_call_operand.vmem [shape: f32[2,4,256], index: 1, kind: input, shape index: {}]   ;;  %s705_s2 = inlined_call_operand.vmem [shape: f32[4,4], index: 2, kind: input, shape index: {}]   ;;  %s706_s3 = inlined_call_operand.vmem [shape: f32[2,4,256], index: 3, kind: output, shape index: {0}]   ;;  %s707_s4 = inlined_call_operand.vmem [shape: f32[4,1], index: 4, kind: output, shape index: {1}]   ;;  %s708_s5 = inlined_call_operand.vmem [shape: f32[4,1], index: 5, kind: output, shape index: {2}]  }
   0x1   :  { %s644_s20 = smov 0  }
   0x2 LB: > { %s28_s21 = sadd.s32 1, %s602_s19  ;;  %p540_p0 = scmp.ge.s32.totalorder %s606_s20, 1  ;;  %s606_s20 = sphi %s644_s20, %s16_s20   ;;  %s602_s19 = sphi %s642_s19, %s710_s19   ;;  %s598_s18 = sphi %s640_s18, %s709_s18  }
   0x3   : > { %p30_p1 = scmp.ge.s32.totalorder %s28_s21, 2  ;;  %p220_p2 = scmp.lt.s32.totalorder %s606_s20, 3 }
   0x5   : > { %s712_s21 = smov (%p30_p1, %s28_s21), 0  ;;  %p221_p3 = pnand %p540_p0, %p220_p2 }
   0x6   : > { %p266_p4 = scmp.lt.s32.totalorder (!%p221_p3), %s598_s18, 1  ;;  %p295_p5 = scmp.eq.s32.totalorder (!%p221_p3), %s598_s18, 0 }
   0x7   : > { %224 = sbr.rel (%p221_p3) target bundleno = 371 (0x173), region = 32 }
   0xc   : > { %s714_s18 = smov (!%p266_p4, %s598_s18), 1  ;;  %300 = sbr.rel (!%p295_p5) target bundleno = 17 (0x11), region = 36  ;;  %vm301_vm0 = vcmask (%p295_p5), 3072   ;;  %v608_v0 = vmov (%p295_p5), 0.0  }
   0xd   : > { %s553_s22 = sshll.u32 %s714_s18, 3  ;;  %302 = vst.msk [vmem:[%s707_s4] sm:$0xf] (%p295_p5), %vm301_vm0, %v608_v0  ;;  %303 = vst.msk [vmem:[%s708_s5] sm:$0xf] (%p295_p5), %vm301_vm0, %v608_v0 }
   0xe   : > { %s273_s25 = scalar_lea.vmem %s703_s0, %s553_s22  ;;  %s283_s28 = scalar_lea.vmem %s704_s1, %s553_s22 }
   0xf   : > { %s293_s6 = scalar_lea.vmem %s706_s3, %s553_s22 }
  0x11 PF: > { %v306_v1 = vld [vmem:[%s283_s28] sm:$0xff]  ;;  %vm313_vm1 = vcmask 1043456   ;;  %v609_v3 = vmov 0.0   ;;  %vm309_vm2 = vcmask 31744   ;;  %vm405_vm3 = vcmask 3072  }
  0x12   : > { %v308_v2 = vcombine.high %v306_v1, %v306_v1  ;;  %382 = vmatprep.mubr.f32.mxu0 %v609_v3  ;;  %v305_v4 = vld [vmem:[%s705_s2] sm:$0xf] }
  0x13   : > { %v304_v6 = vld [vmem:[%s273_s25] sm:$0xff] }
  0x14   : > { %548 = vmatprep.subr.msk.mxu0 %vm313_vm1, %v308_v2  ;;  %v395_v19 = vld [vmem:[%s707_s4] sm:$0xf] }
  0x15   : > { %549 = vmatpush1.msk.msra.mxu0 %vm313_vm1, %v306_v1  ;;  %v407_v22 = vld [vmem:[%s708_s5] sm:$0xf] }
  0x16   : > { %550 = vmatmul.mubr.msk.f32.vlgmr.msra.gmra.mxu0 %vm309_vm2, %v305_v4 }
  0xd6   : > { %v384_v5 = vpop.f32.mrf.mxu0 }
  0xd8   : > { %v386_v7 = vpop.f32.mrf.mxu0 }
  0xd9   : > { %v391_v8 = vcombine.low %v384_v5, %v386_v7 }
  0xdb   : > { %v393_v9 = vadd.f32 %v391_v8, %v304_v6 }
  0xdd   : > { %394 = vst [vmem:[%s293_s6] sm:$0xff] %v393_v9  ;;  %v397_v10 = vcombine.high %v393_v9, %v393_v9  ;;  %v408_v11 = vmul.f32 %v393_v9, %v393_v9  ;;  %v399_v12 = vsel %vm313_vm1, %v393_v9, 0.0 }
  0xdf   : > { %v400_v13 = vsel %vm313_vm1, %v397_v10, 0.0  ;;  %v410_v14 = vcombine.high %v408_v11, %v408_v11  ;;  %v412_v17 = vsel %vm313_vm1, %v408_v11, 0.0 }
  0xe0   : > { %v401_v15 = vadd.f32 %v400_v13, %v399_v12 }
  0xe1   : > { %v413_v16 = vsel %vm313_vm1, %v410_v14, 0.0 }
  0xe2   : > { %402 = vadd.xlane.f32.xlu0 %v401_v15  ;;  %v414_v18 = vadd.f32 %v413_v16, %v412_v17 }
  0xe6   : > { %415 = vadd.xlane.f32.xlu0 %v414_v18 }
 0x16b   : > { %v403_v20 = vpop.xlane.xlu0 %402 }
 0x16c   : > { %v404_v21 = vadd.f32 %v403_v20, %v395_v19 }
 0x16e   : > { %406 = vst.msk [vmem:[%s707_s4] sm:$0xf] %vm405_vm3, %v404_v21 }
 0x16f   : > { %v416_v23 = vpop.xlane.xlu0 %415 }
 0x170   : > { %v417_v24 = vadd.f32 %v416_v23, %v407_v22 }
 0x172   : > { %418 = vst.msk [vmem:[%s708_s5] sm:$0xf] %vm405_vm3, %v417_v24 }
 0x173 PF: > { %s16_s20 = sadd.s32 1, %s606_s20   ;;  %s709_s18 = smov %s602_s19 }
 0x174   : > { %p13_p6 = scmp.ge.s32.totalorder %s16_s20, 4   ;;  %s710_s19 = smov %s712_s21 }
 0x176   :  { %15 = sbr.rel (!%p13_p6) target bundleno = 2 (0x2), region = 85 }

// kernel: neural_fourier_block2d.5
= control target key start
LH: loop header
LB: loop body
LE: loop exit
PB: predicated region body
PF: predicated region fallthrough
CT: control target
= control target key end

     0   :  { %s414_s12 = smov 0   ;;  %s416_s13 = smov 0   ;;  %s453_s0 = inlined_call_operand.vmem [shape: f32[2,4,256], index: 0, kind: input, shape index: {}, may-alias: {0,3}]   ;;  %s454_s1 = inlined_call_operand.vmem [shape: f32[4,1], index: 1, kind: input, shape index: {}]   ;;  %s455_s2 = inlined_call_operand.vmem [shape: f32[4,1], index: 2, kind: input, shape index: {}]   ;;  %s456_s3 = inlined_call_operand.vmem [shape: f32[2,4,256], index: 3, kind: output, shape index: {}, may-alias: {0,3}]  }
   0x1   :  { %s418_s14 = smov 0  }
   0x2 LB: > { %s25_s15 = sadd.s32 1, %s386_s13  ;;  %p332_p0 = scmp.ge.s32.totalorder %s390_s14, 1  ;;  %s390_s14 = sphi %s418_s14, %s13_s14   ;;  %s386_s13 = sphi %s416_s13, %s458_s13   ;;  %s382_s12 = sphi %s414_s12, %s457_s12  }
   0x3   : > { %p27_p1 = scmp.ge.s32.totalorder %s25_s15, 2  ;;  %p158_p2 = scmp.lt.s32.totalorder %s390_s14, 3 }
   0x5   : > { %s460_s15 = smov (%p27_p1, %s25_s15), 0  ;;  %p159_p3 = pnand %p332_p0, %p158_p2 }
   0x6   : > { %p191_p4 = scmp.lt.s32.totalorder (!%p159_p3), %s382_s12, 1 }
   0x7   : > { %162 = sbr.rel (%p159_p3) target bundleno = 149 (0x95), region = 32 }
   0xc   : > { %v211_v0 = vld [vmem:[%s454_s1] sm:$0xf]  ;;  %v392_v1 = vmov 0   ;;  %v393_v3 = vmov 839922192   ;;  %v219_v5 = vlaneseq  ;;  %s462_s12 = smov (!%p191_p4, %s382_s12), 1 }
   0xd   : > { %367 = vset.pattern.permute.xlu0 %v392_v1  ;;  %v225_v2 = vld [vmem:[%s455_s2] sm:$0xf]  ;;  %v217_v4 = vunpack.c.l.s4 %v393_v3  ;;  %s339_s20 = sshll.u32 %s462_s12, 3 }
   0xe   : > { %214 = vperm.xlu0 %367, %v211_v0   ;;  %v220_v7 = vshrl.u32 %v219_v5, 7  ;;  %s198_s23 = scalar_lea.vmem %s453_s0, %s339_s20  ;;  %s208_s26 = scalar_lea.vmem %s456_s3, %s339_s20 }
   0xf   : > { %v218_v6 = vunpack.c.0.s8 %v217_v4  ;;  %v210_v11 = vld [vmem:[%s198_s23] sm:$0xff] }
  0x11   : > { %v221_v8 = vsub.s32 %v218_v6, %v220_v7 }
  0x12   : > { %228 = vperm.xlu0 %367, %v225_v2  }
  0x89   : > { %v215_v9 = vpop.permute.xlu0 %214 }
  0x8a   : > { %v222_v10 = vrot.slane %v215_v9, %v221_v8 }
  0x8c   : > { %v224_v13 = vmul.f32 %v222_v10, %v210_v11 }
  0x8d   : > { %v229_v12 = vpop.permute.xlu0 %228 }
  0x8e   : > { %v236_v14 = vrot.slane %v229_v12, %v221_v8 }
  0x90   : > { %v238_v15 = vadd.f32 %v236_v14, %v224_v13 }
  0x92   : > { %v239_v16 = vmax.f32 %v238_v15, 0.0 }
  0x94   : > { %240 = vst [vmem:[%s208_s26] sm:$0xff] %v239_v16 }
  0x95 PF: > { %s13_s14 = sadd.s32 1, %s390_s14   ;;  %s457_s12 = smov %s386_s13 }
  0x96   : > { %p10_p5 = scmp.ge.s32.totalorder %s13_s14, 4   ;;  %s458_s13 = smov %s460_s15 }
  0x98   :  { %12 = sbr.rel (!%p10_p5) target bundleno = 2 (0x2), region = 62 }

</bundles_post_ra>
